<compile_context>
chip_gen: v7x
topology: tpu7x:2x2x1
jax: 0.10.0
libtpu: 0.0.40
codegen_flags: <defaults>
</compile_context>

<pallas_src>
import functools

import jax
import jax.numpy as jnp
from jax.experimental import pallas as pl
from jax.experimental.pallas import tpu as pltpu


# ----------------------------- kernels ------------------------------------ #

def _bn1d_train_fused_kernel(x_ref, w_ref, b_ref, y_ref, mean_ref, var_ref, *, eps):
    """One feature tile holding all N rows: one-pass sum/sumsq stats + fused affine."""
    x = x_ref[...].astype(jnp.float32)                       # (N, TF)
    inv_n = 1.0 / x.shape[0]
    # Single pass: sum and sum-of-squares together (no centered temporary,
    # no second full read of the tile). Accumulation stays in f32.
    s = jnp.sum(x, axis=0, keepdims=True)                    # (1, TF)
    sq = jnp.sum(x * x, axis=0, keepdims=True)               # (1, TF)
    mean = s * inv_n
    var = jnp.maximum(sq * inv_n - mean * mean, 0.0)         # biased (unbiased=False)
    inv_std = jax.lax.rsqrt(var + eps)
    # Fold the affine into per-feature scale/shift -> per-element path is mul+add.
    scale = inv_std * w_ref[...].astype(jnp.float32)
    shift = b_ref[...].astype(jnp.float32) - mean * scale
    y_ref[...] = (x * scale + shift).astype(y_ref.dtype)
    mean_ref[...] = mean
    var_ref[...] = var


def _bn1d_stats_kernel(x_ref, sum_ref, sumsq_ref, *, n_total, tn):
    """Large-N path, pass 1: accumulate sum / sumsq over N tiles (N axis last, arbitrary)."""
    ni = pl.program_id(1)

    @pl.when(ni == 0)
    def _():
        sum_ref[...] = jnp.zeros_like(sum_ref)
        sumsq_ref[...] = jnp.zeros_like(sumsq_ref)

    x = x_ref[...].astype(jnp.float32)                       # (TN, TF)
    if n_total % tn != 0:
        # Ragged last N tile: zero the padded rows so they don't pollute the stats.
        row = jax.lax.broadcasted_iota(jnp.int32, x.shape, 0) + ni * tn
        x = jnp.where(row < n_total, x, 0.0)
    sum_ref[...] += jnp.sum(x, axis=0, keepdims=True)
    sumsq_ref[...] += jnp.sum(x * x, axis=0, keepdims=True)


def _scale_shift_kernel(x_ref, scale_ref, shift_ref, y_ref):
    """Pure elementwise y = x*scale + shift (eval mode & large-N normalize pass)."""
    y_ref[...] = (x_ref[...].astype(jnp.float32) * scale_ref[...]
                  + shift_ref[...]).astype(y_ref.dtype)


# ----------------------------- tiling helpers ------------------------------ #

_TF_CANDIDATES = (8192, 4096, 2048, 1024, 512, 256, 128)


def _vmem_capacity_bytes():
    try:
        cap = getattr(pltpu.get_tpu_info(), "vmem_capacity_bytes", None)
        if cap:
            return int(cap)
    except Exception:
        pass
    return 64 * 1024 * 1024   # conservative (v7x-sized) fallback


def _plan_tiles(n, f, max_tile_f32_bytes, min_feature_steps):
    """Pick (tf, tn). Budget is in f32 bytes of one x tile (the kernel upcasts)."""
    if f <= 128:
        tf = f                                              # full-extent lane block
    else:
        viable = [c for c in _TF_CANDIDATES
                  if c <= f and 8 * c * 4 <= max_tile_f32_bytes]
        if not viable:
            viable = [128]
        # Prefer enough feature-grid steps to keep both v7x TensorCores busy;
        # otherwise just take the widest lane-dense tile within budget.
        preferred = [c for c in viable if pl.cdiv(f, c) >= min_feature_steps]
        tf = (preferred or viable)[0]
    if n * tf * 4 <= max_tile_f32_bytes:
        tn = n                                              # whole batch fits: fused path
    else:
        tn = max(8, (max_tile_f32_bytes // (tf * 4)) // 8 * 8)
        tn = min(tn, n) if n >= 8 else n
    return tf, tn


# ----------------------------- wrapper ------------------------------------- #

def _apply_scale_shift(x, scale, shift, tf, tn, compiler_params):
    n, f = x.shape
    grid = (pl.cdiv(f, tf), pl.cdiv(n, tn))
    x_spec = pl.BlockSpec((tn, tf), lambda fi, ni: (ni, fi))
    row_spec = pl.BlockSpec((1, tf), lambda fi, ni: (0, fi))
    return pl.pallas_call(
        _scale_shift_kernel,
        grid=grid,
        in_specs=[x_spec, row_spec, row_spec],
        out_specs=x_spec,
        out_shape=jax.ShapeDtypeStruct((n, f), x.dtype),
        compiler_params=compiler_params,
    )(x, scale.reshape(1, f).astype(jnp.float32),
      shift.reshape(1, f).astype(jnp.float32))


def my_batch_norm1d(x, weight, bias, running_mean, running_var, *,
                    eps=1e-5, momentum=0.1, training=True,
                    max_tile_f32_bytes=None):
    """JAX/Pallas equivalent of MyBatchNorm1d.forward.

    Returns (y, new_running_mean, new_running_var). In eval mode the running
    stats are returned unchanged and used for normalization.
    """
    assert x.ndim == 2
    n, f = x.shape

    cap = _vmem_capacity_bytes()
    small_vmem = cap <= 80 * 1024 * 1024            # v7x-class chip (64 MiB VMEM)
    if max_tile_f32_bytes is None:
        # Budget the f32 working set of one x tile (kernel upcasts): leaves room
        # for double-buffered x/y plus the in-kernel f32 copy on every chip.
        max_tile_f32_bytes = (4 if small_vmem else 16) * 1024 * 1024
    vmem_limit = int(max(32 * 1024 * 1024,
                         min(cap - 16 * 1024 * 1024, 96 * 1024 * 1024)))
    min_feature_steps = 8 if small_vmem else 1      # keep both v7x TCs fed
    tf, tn = _plan_tiles(n, f, max_tile_f32_bytes, min_feature_steps)

    params_p = pltpu.CompilerParams(dimension_semantics=("parallel",),
                                    vmem_limit_bytes=vmem_limit)
    params_pp = pltpu.CompilerParams(dimension_semantics=("parallel", "parallel"),
                                     vmem_limit_bytes=vmem_limit)
    params_pa = pltpu.CompilerParams(dimension_semantics=("parallel", "arbitrary"),
                                     vmem_limit_bytes=vmem_limit)

    if not training:
        # Eval: fold running stats + affine into per-feature scale/shift in plain
        # JAX, so the kernel reads only 2 row inputs and does one mul+add/elem.
        inv_std = jax.lax.rsqrt(running_var.astype(jnp.float32) + eps)
        scale = weight.astype(jnp.float32) * inv_std
        shift = bias.astype(jnp.float32) - running_mean.astype(jnp.float32) * scale
        y = _apply_scale_shift(x, scale, shift, tf, tn, params_pp)
        return y, running_mean, running_var

    if tn == n:
        # Fused single-pass path: one read of x, stats + normalize per feature tile.
        grid = (pl.cdiv(f, tf),)
        x_spec = pl.BlockSpec((n, tf), lambda j: (0, j))
        row_spec = pl.BlockSpec((1, tf), lambda j: (0, j))
        y, mean2, var2 = pl.pallas_call(
            functools.partial(_bn1d_train_fused_kernel, eps=eps),
            grid=grid,
            in_specs=[x_spec, row_spec, row_spec],
            out_specs=(x_spec, row_spec, row_spec),
            out_shape=(jax.ShapeDtypeStruct((n, f), x.dtype),
                       jax.ShapeDtypeStruct((1, f), jnp.float32),
                       jax.ShapeDtypeStruct((1, f), jnp.float32)),
            compiler_params=params_p,
        )(x, weight.reshape(1, f), bias.reshape(1, f))
        mean = mean2.reshape(f)
        var = var2.reshape(f)
    else:
        # Large-N path: pass 1 accumulates sum/sumsq over N tiles (bounded DMAs),
        # pass 2 is the elementwise normalize with precomputed scale/shift.
        grid = (pl.cdiv(f, tf), pl.cdiv(n, tn))
        x_spec = pl.BlockSpec((tn, tf), lambda fi, ni: (ni, fi))
        row_spec = pl.BlockSpec((1, tf), lambda fi, ni: (0, fi))
        s2, sq2 = pl.pallas_call(
            functools.partial(_bn1d_stats_kernel, n_total=n, tn=tn),
            grid=grid,
            in_specs=[x_spec],
            out_specs=(row_spec, row_spec),
            out_shape=(jax.ShapeDtypeStruct((1, f), jnp.float32),
                       jax.ShapeDtypeStruct((1, f), jnp.float32)),
            compiler_params=params_pa,
        )(x)
        mean = s2.reshape(f) / n
        var = jnp.maximum(sq2.reshape(f) / n - mean * mean, 0.0)
        inv_std = jax.lax.rsqrt(var + eps)
        scale = weight.astype(jnp.float32) * inv_std
        shift = bias.astype(jnp.float32) - mean * scale
        y = _apply_scale_shift(x, scale, shift, tf, tn, params_pp)

    # Running-stat updates are tiny (F,) elementwise glue; keep in plain JAX.
    # Note: n == 1 yields inf in the unbiased correction, exactly as PyTorch would.
    new_running_mean = momentum * mean + (1.0 - momentum) * running_mean
    new_running_var = (momentum * var * n / (n - 1)
                       + (1.0 - momentum) * running_var)
    return y, new_running_mean, new_running_var


# ----------------------------- reference & test ----------------------------- #

def _reference_train(x, weight, bias, running_mean, running_var, eps, momentum):
    n = x.shape[0]
    mean = jnp.mean(x, axis=0)
    var = jnp.mean((x - mean) ** 2, axis=0)  # unbiased=False
    new_rm = momentum * mean + (1 - momentum) * running_mean
    new_rv = momentum * var * n / (n - 1) + (1 - momentum) * running_var
    y = (x - mean) / jnp.sqrt(var + eps) * weight + bias
    return y, new_rm, new_rv


def _reference_eval(x, weight, bias, running_mean, running_var, eps):
    return (x - running_mean) / jnp.sqrt(running_var + eps) * weight + bias


if __name__ == "__main__":
    key = jax.random.PRNGKey(0)
    eps, momentum = 1e-5, 0.1

    # Case 1: small shape matching the module's 2-D input (F < 128, single tile).
    N, F = 8, 32
    k1, k2, k3, k4, k5, k6 = jax.random.split(key, 6)
    x = jax.random.normal(k1, (N, F), dtype=jnp.float32)
    weight = jnp.ones((F,), dtype=jnp.float32)
    bias = jnp.zeros((F,), dtype=jnp.float32)
    running_mean = jnp.zeros((F,), dtype=jnp.float32)
    running_var = jnp.ones((F,), dtype=jnp.float32)

    y, rm, rv = my_batch_norm1d(x, weight, bias, running_mean, running_var,
                                eps=eps, momentum=momentum, training=True)
    jax.block_until_ready((y, rm, rv))
    y_ref, rm_ref, rv_ref = _reference_train(x, weight, bias, running_mean,
                                             running_var, eps, momentum)
    assert jnp.allclose(y, y_ref, atol=1e-4, rtol=1e-4)
    assert jnp.allclose(rm, rm_ref, atol=2e-5, rtol=1e-4)
    assert jnp.allclose(rv, rv_ref, atol=2e-5, rtol=1e-4)

    ye, _, _ = my_batch_norm1d(x, weight, bias, rm, rv,
                               eps=eps, momentum=momentum, training=False)
    jax.block_until_ready(ye)
    ye_ref = _reference_eval(x, weight, bias, rm, rv, eps)
    assert jnp.allclose(ye, ye_ref, atol=1e-4, rtol=1e-4)

    # Case 2: lane-dense multi-tile fused path (F = 384, ragged last feature tile).
    N2, F2 = 16, 384
    x2 = jax.random.normal(k2, (N2, F2), dtype=jnp.float32)
    w2 = 1.0 + 0.1 * jax.random.normal(k3, (F2,), dtype=jnp.float32)
    b2 = 0.1 * jax.random.normal(k4, (F2,), dtype=jnp.float32)
    rm2 = 0.05 * jax.random.normal(k5, (F2,), dtype=jnp.float32)
    rv2 = jnp.ones((F2,), dtype=jnp.float32) * 1.3

    y2, nrm2, nrv2 = my_batch_norm1d(x2, w2, b2, rm2, rv2,
                                     eps=eps, momentum=momentum, training=True)
    jax.block_until_ready((y2, nrm2, nrv2))
    y2_ref, rm2_ref, rv2_ref = _reference_train(x2, w2, b2, rm2, rv2, eps, momentum)
    assert jnp.allclose(y2, y2_ref, atol=1e-4, rtol=1e-4)
    assert jnp.allclose(nrm2, rm2_ref, atol=2e-5, rtol=1e-4)
    assert jnp.allclose(nrv2, rv2_ref, atol=2e-5, rtol=1e-4)

    y2e, _, _ = my_batch_norm1d(x2, w2, b2, rm2, rv2,
                                eps=eps, momentum=momentum, training=False)
    jax.block_until_ready(y2e)
    y2e_ref = _reference_eval(x2, w2, b2, rm2, rv2, eps)
    assert jnp.allclose(y2e, y2e_ref, atol=1e-4, rtol=1e-4)

    # Case 3: force the large-N two-pass path with a tiny tile budget, plus
    # ragged N (40 % 16 != 0) and ragged F (200 % 128 != 0) tiles.
    N3, F3 = 40, 200
    x3 = 0.5 + 2.0 * jax.random.normal(k6, (N3, F3), dtype=jnp.float32)
    w3 = 1.0 + 0.1 * jax.random.normal(k3, (F3,), dtype=jnp.float32)
    b3 = 0.1 * jax.random.normal(k4, (F3,), dtype=jnp.float32)
    rm3 = jnp.zeros((F3,), dtype=jnp.float32)
    rv3 = jnp.ones((F3,), dtype=jnp.float32)

    y3, nrm3, nrv3 = my_batch_norm1d(x3, w3, b3, rm3, rv3,
                                     eps=eps, momentum=momentum, training=True,
                                     max_tile_f32_bytes=8192)
    jax.block_until_ready((y3, nrm3, nrv3))
    y3_ref, rm3_ref, rv3_ref = _reference_train(x3, w3, b3, rm3, rv3, eps, momentum)
    assert jnp.allclose(y3, y3_ref, atol=1e-4, rtol=1e-4)
    assert jnp.allclose(nrm3, rm3_ref, atol=2e-5, rtol=1e-4)
    assert jnp.allclose(nrv3, rv3_ref, atol=2e-4, rtol=1e-4)

    y3e, _, _ = my_batch_norm1d(x3, w3, b3, rm3, rv3,
                                eps=eps, momentum=momentum, training=False,
                                max_tile_f32_bytes=8192)
    jax.block_until_ready(y3e)
    y3e_ref = _reference_eval(x3, w3, b3, rm3, rv3, eps)
    assert jnp.allclose(y3e, y3e_ref, atol=1e-4, rtol=1e-4)

    print("KERNEL_OK")
</pallas_src>

<mosaic_0001>
module attributes {stable_mosaic.version = 11 : i64} {
  func.func @_bn1d_train_fused_kernel(%arg0: i32, %arg1: memref<8x32xf32, #tpu.memory_space<vmem>>, %arg2: memref<1x32xf32, #tpu.memory_space<vmem>>, %arg3: memref<1x32xf32, #tpu.memory_space<vmem>>, %arg4: memref<8x32xf32, #tpu.memory_space<vmem>>, %arg5: memref<1x32xf32, #tpu.memory_space<vmem>>, %arg6: memref<1x32xf32, #tpu.memory_space<vmem>>) attributes {dimension_semantics = [#tpu.dimension_semantics<parallel>], iteration_bounds = array<i64: 1>, scalar_prefetch = 0 : i64, scratch_operands = 0 : i64, tpu.core_type = #tpu.core_type<tc>, window_params = [{transform_indices = @transform_0, window_bounds = array<i64: 8, 32>}, {transform_indices = @transform_1, window_bounds = array<i64: 1, 32>}, {transform_indices = @transform_2, window_bounds = array<i64: 1, 32>}, {transform_indices = @transform_3, window_bounds = array<i64: 8, 32>}, {transform_indices = @transform_4, window_bounds = array<i64: 1, 32>}, {transform_indices = @transform_5, window_bounds = array<i64: 1, 32>}]} {
    %c0 = arith.constant 0 : index
    %c0_0 = arith.constant 0 : index
    %0 = vector.load %arg1[%c0, %c0_0] : memref<8x32xf32, #tpu.memory_space<vmem>>, vector<8x32xf32>
    %cst = arith.constant dense<0.000000e+00> : vector<32xf32>
    %1 = vector.multi_reduction <add>, %0, %cst [0] : vector<8x32xf32> to vector<32xf32>
    %2 = vector.shape_cast %1 : vector<32xf32> to vector<1x32xf32>
    %3 = arith.mulf %0, %0 : vector<8x32xf32>
    %cst_1 = arith.constant dense<0.000000e+00> : vector<32xf32>
    %4 = vector.multi_reduction <add>, %3, %cst_1 [0] : vector<8x32xf32> to vector<32xf32>
    %5 = vector.shape_cast %4 : vector<32xf32> to vector<1x32xf32>
    %cst_2 = arith.constant 1.250000e-01 : f32
    %6 = vector.broadcast %cst_2 : f32 to vector<1x32xf32>
    %7 = arith.mulf %2, %6 : vector<1x32xf32>
    %cst_3 = arith.constant 1.250000e-01 : f32
    %8 = vector.broadcast %cst_3 : f32 to vector<1x32xf32>
    %9 = arith.mulf %5, %8 : vector<1x32xf32>
    %10 = arith.mulf %7, %7 : vector<1x32xf32>
    %11 = arith.subf %9, %10 : vector<1x32xf32>
    %cst_4 = arith.constant 0.000000e+00 : f32
    %12 = vector.broadcast %cst_4 : f32 to vector<1x32xf32>
    %13 = arith.maximumf %11, %12 : vector<1x32xf32>
    %cst_5 = arith.constant 9.99999974E-6 : f32
    %14 = vector.broadcast %cst_5 : f32 to vector<1x32xf32>
    %15 = arith.addf %13, %14 : vector<1x32xf32>
    %16 = math.rsqrt %15 : vector<1x32xf32>
    %c0_6 = arith.constant 0 : index
    %c0_7 = arith.constant 0 : index
    %17 = vector.load %arg2[%c0_6, %c0_7] : memref<1x32xf32, #tpu.memory_space<vmem>>, vector<1x32xf32>
    %18 = arith.mulf %16, %17 : vector<1x32xf32>
    %c0_8 = arith.constant 0 : index
    %c0_9 = arith.constant 0 : index
    %19 = vector.load %arg3[%c0_8, %c0_9] : memref<1x32xf32, #tpu.memory_space<vmem>>, vector<1x32xf32>
    %20 = arith.mulf %7, %18 : vector<1x32xf32>
    %21 = arith.subf %19, %20 : vector<1x32xf32>
    %22 = vector.broadcast %18 : vector<1x32xf32> to vector<8x32xf32>
    %23 = arith.mulf %0, %22 : vector<8x32xf32>
    %24 = vector.broadcast %21 : vector<1x32xf32> to vector<8x32xf32>
    %25 = arith.addf %23, %24 : vector<8x32xf32>
    %c0_10 = arith.constant 0 : index
    %c0_11 = arith.constant 0 : index
    %26 = vector.load %arg4[%c0_10, %c0_11] : memref<8x32xf32, #tpu.memory_space<vmem>>, vector<8x32xf32>
    tpu.vector_store %arg4[%c0_10, %c0_11], %25 {strides = array<i32>} : memref<8x32xf32, #tpu.memory_space<vmem>>, vector<8x32xf32>,
    %c0_12 = arith.constant 0 : index
    %c0_13 = arith.constant 0 : index
    %27 = vector.load %arg5[%c0_12, %c0_13] : memref<1x32xf32, #tpu.memory_space<vmem>>, vector<1x32xf32>
    tpu.vector_store %arg5[%c0_12, %c0_13], %7 {strides = array<i32>} : memref<1x32xf32, #tpu.memory_space<vmem>>, vector<1x32xf32>,
    %c0_14 = arith.constant 0 : index
    %c0_15 = arith.constant 0 : index
    %28 = vector.load %arg6[%c0_14, %c0_15] : memref<1x32xf32, #tpu.memory_space<vmem>>, vector<1x32xf32>
    tpu.vector_store %arg6[%c0_14, %c0_15], %13 {strides = array<i32>} : memref<1x32xf32, #tpu.memory_space<vmem>>, vector<1x32xf32>,
    return
  }
  func.func @transform_0(%arg0: i32) -> (i32, i32) {
    %c0_i32 = arith.constant 0 : i32
    %c0_i32_0 = arith.constant 0 : i32
    return %c0_i32, %arg0 : i32, i32
  }
  func.func @transform_1(%arg0: i32) -> (i32, i32) {
    %c0_i32 = arith.constant 0 : i32
    %c0_i32_0 = arith.constant 0 : i32
    return %c0_i32, %arg0 : i32, i32
  }
  func.func @transform_2(%arg0: i32) -> (i32, i32) {
    %c0_i32 = arith.constant 0 : i32
    %c0_i32_0 = arith.constant 0 : i32
    return %c0_i32, %arg0 : i32, i32
  }
  func.func @transform_3(%arg0: i32) -> (i32, i32) {
    %c0_i32 = arith.constant 0 : i32
    %c0_i32_0 = arith.constant 0 : i32
    return %c0_i32, %arg0 : i32, i32
  }
  func.func @transform_4(%arg0: i32) -> (i32, i32) {
    %c0_i32 = arith.constant 0 : i32
    %c0_i32_0 = arith.constant 0 : i32
    return %c0_i32, %arg0 : i32, i32
  }
  func.func @transform_5(%arg0: i32) -> (i32, i32) {
    %c0_i32 = arith.constant 0 : i32
    %c0_i32_0 = arith.constant 0 : i32
    return %c0_i32, %arg0 : i32, i32
  }
}

</mosaic_0001>

<bundles_post_ra>
// kernel: tpu_custom_call.1
= control target key start
LH: loop header
LB: loop body
LE: loop exit
PB: predicated region body
PF: predicated region fallthrough
CT: control target
= control target key end

     0   :  { %11 = vsyncpa [#allocation3], 0  ;;  %s317_s0 = inlined_call_operand.hbm [shape: f32[8,32], index: 0, kind: input, shape index: {}]   ;;  %s318_s1 = inlined_call_operand.vmem [shape: f32[1,32], index: 1, kind: input, shape index: {}]   ;;  %s319_s2 = inlined_call_operand.vmem [shape: f32[1,32], index: 2, kind: input, shape index: {}]   ;;  %s320_s3 = inlined_call_operand.hbm [shape: f32[8,32], index: 3, kind: output, shape index: {0}]   ;;  %s321_s4 = inlined_call_operand.hbm [shape: f32[1,32], index: 4, kind: output, shape index: {1}]   ;;  %s322_s5 = inlined_call_operand.hbm [shape: f32[1,32], index: 5, kind: output, shape index: {2}]  }
   0x1   :  { %12 = vsyncpa [#allocation4], 0 }
   0x2   :  { %13 = vsyncpa [#allocation7], 0  ;;  %s218_s18 = smov [#allocation2]   ;;  %s124_s22 = scalar_lea.hbm %s317_s0, 128 }
   0x3   :  { %s20_s19 = sshll.u32 %s218_s18, 4  ;;  %p125_p0 = scmp.ne.s32.totalorder %s317_s0, %s124_s22  ;;  %s21_s19 = int_to_ptr.vmem [resolvable:$true] %s20_s19 }
   0x4   :  { %p128_p1 = scmp.lt.u32.totalorder %s124_s22, %s317_s0 }
   0x6   :  { %p130_p2 = pnand %p128_p1, %p125_p0 }
   0x8   :  { %133 = shalt.err (!%p130_p2)
}
   0x9   :  { %s134_s27 = scalar_lea.vmem %s21_s19, 128  ;;  %p139_p4 = scmp.lt.s32.totalorder %s21_s19, %s21_s19 }
   0xa   :  { %p135_p3 = scmp.ne.s32.totalorder %s21_s19, %s134_s27  ;;  %p140_p5 = scmp.lt.s32.totalorder %s134_s27, %s134_s27 }
   0xc   :  { %p141_p6 = por %p140_p5, %p139_p4 }
   0xe   :  { %p142_p7 = pnand %p141_p6, %p135_p3 }
  0x10   :  { %145 = shalt.err (!%p142_p7)
}
  0x11   :  { %23 = dma.hbm_to_vmem [thread:$0]  %s317_s0, 128, %s21_s19, [#allocation3]  }
  0x12   :  { %212 = dma.done.wait [#allocation3], 128  }
  0x13   :  { %213 = vsyncadd [#allocation3], 4294967168  ;;  %vm32_vm0 = vcmask 261120   ;;  %v264_v0 = vld [vmem:[#allocation2] sm:$0xff]  ;;  %s219_s0 = smov [#allocation6]   ;;  %vm73_vm1 = vcmask 253952  }
  0x14   :  { %v33_v1 = vsel %vm32_vm0, %v264_v0, 0.0  ;;  %v40_v2 = vmul.f32 %v264_v0, %v264_v0  ;;  %s92_s30 = sshll.u32 %s219_s0, 4  ;;  %s220_s6 = smov [#allocation8]   ;;  %s93_s30 = int_to_ptr.vmem [resolvable:$true] %s92_s30 }
  0x15   :  { %v34_v3 = vrot.slane %v33_v1, 4  ;;  %s102_s7 = sshll.u32 %s220_s6, 4  ;;  %s146_s8 = scalar_lea.vmem %s93_s30, 16  ;;  %s103_s7 = int_to_ptr.vmem [resolvable:$true] %s102_s7 }
  0x16   :  { %v41_v4 = vsel %vm32_vm0, %v40_v2, 0.0  ;;  %p147_p8 = scmp.ne.s32.totalorder %s93_s30, %s146_s8  ;;  %s150_s9 = scalar_lea.vmem %s93_s30, 32 }
  0x17   :  { %v35_v5 = vadd.f32 %v34_v3, %v33_v1  ;;  %v42_v6 = vrot.slane %v41_v4, 4  ;;  %p151_p9 = scmp.lt.s32.totalorder %s93_s30, %s93_s30  ;;  %p152_p10 = scmp.lt.s32.totalorder %s150_s9, %s146_s8 }
  0x19   :  { %v36_v7 = vrot.slane %v35_v5, 2  ;;  %v43_v8 = vadd.f32 %v42_v6, %v41_v4  ;;  %p153_p11 = por %p152_p10, %p151_p9 }
  0x1b   :  { %v37_v9 = vadd.f32 %v36_v7, %v35_v5  ;;  %v44_v10 = vrot.slane %v43_v8, 2  ;;  %p154_p12 = pnand %p153_p11, %p147_p8 }
  0x1d   :  { %v38_v11 = vrot.slane %v37_v9, 1  ;;  %v45_v12 = vadd.f32 %v44_v10, %v43_v8 }
  0x1f   :  { %v39_v13 = vadd.f32 %v38_v11, %v37_v9  ;;  %v46_v14 = vrot.slane %v45_v12, 1 }
  0x21   :  { %v47_v15 = vadd.f32 %v46_v14, %v45_v12  ;;  %v48_v16 = vmul.f32 0.125, %v39_v13 }
  0x23   :  { %v49_v17 = vmul.f32 0.125, %v47_v15  ;;  %v50_v18 = vmul.f32 %v48_v16, %v48_v16  ;;  %74 = vst.msk [vmem:[#allocation6] sm:$0x1] %vm73_vm1, %v48_v16 }
  0x24   :  { %157 = shalt.err (!%p154_p12)
}
  0x25   :  { %s158_s12 = scalar_lea.hbm %s321_s4, 16 }
  0x26   :  { %p159_p13 = scmp.ne.s32.totalorder %s321_s4, %s158_s12  ;;  %p162_p0 = scmp.lt.u32.totalorder %s158_s12, %s321_s4 }
  0x28   :  { %p164_p1 = pnand %p162_p0, %p159_p13 }
  0x2a   :  { %167 = shalt.err (!%p164_p1)
}
  0x2b   :  { %95 = dma.vmem_to_hbm [thread:$0]  %s93_s30, 16, %s321_s4, [#allocation7]   ;;  %v51_v19 = vsub.f32 %v49_v17, %v50_v18 }
  0x2c   :  { %s168_s19 = scalar_lea.vmem %s103_s7, 16  ;;  %s172_s20 = scalar_lea.vmem %s103_s7, 32 }
  0x2d   :  { %v52_v20 = vmax.f32 %v51_v19, 0.0  ;;  %p169_p2 = scmp.ne.s32.totalorder %s103_s7, %s168_s19  ;;  %p173_p3 = scmp.lt.s32.totalorder %s103_s7, %s103_s7 }
  0x2e   :  { %p174_p4 = scmp.lt.s32.totalorder %s172_s20, %s168_s19 }
  0x2f   :  { %v53_v21 = vadd.f32 1e-05, %v52_v20  ;;  %75 = vst.msk [vmem:[#allocation8] sm:$0x1] %vm73_vm1, %v52_v20 }
  0x30   :  { %p175_p5 = por %p174_p4, %p173_p3 }
  0x32   :  { %p176_p6 = pnand %p175_p5, %p169_p2 }
  0x34   :  { %179 = shalt.err (!%p176_p6)
}
  0x35   :  { %s180_s23 = scalar_lea.hbm %s322_s5, 16 }
  0x36   :  { %p181_p7 = scmp.ne.s32.totalorder %s322_s5, %s180_s23  ;;  %p184_p8 = scmp.lt.u32.totalorder %s180_s23, %s322_s5 }
  0x38   :  { %p186_p9 = pnand %p184_p8, %p181_p7 }
  0x3a   :  { %189 = shalt.err (!%p186_p9)
}
  0x3b   :  { %105 = dma.vmem_to_hbm [thread:$0]  %s103_s7, 16, %s322_s5, [#allocation7]   ;;  %122 = vrsqrt.f32 %v53_v21  ;;  %v60_v22 = vlaneseq  ;;  %v55_v24 = vld [vmem:[%s318_s1] sm:$0x1] }
  0x3c   :  { %v57_v28 = vld [vmem:[%s319_s2] sm:$0x1]  ;;  %s221_s5 = smov [#allocation5]  }
  0x3d   :  { %v61_v23 = vshrl.u32 %v60_v22, 7  ;;  %s82_s7 = sshll.u32 %s221_s5, 4  ;;  %s83_s7 = int_to_ptr.vmem [resolvable:$true] %s82_s7 }
  0x3e   :  { %s190_s1 = scalar_lea.vmem %s83_s7, 128  ;;  %p195_p11 = scmp.lt.s32.totalorder %s83_s7, %s83_s7 }
  0x3f   :  { %v62_v25 = vsub.s32 0, %v61_v23  ;;  %p191_p10 = scmp.ne.s32.totalorder %s83_s7, %s190_s1  ;;  %p196_p12 = scmp.lt.s32.totalorder %s190_s1, %s190_s1 }
  0x41   :  { %p197_p13 = por %p196_p12, %p195_p11 }
  0x43   :  { %p198_p0 = pnand %p197_p13, %p191_p10 }
  0x45   :  { %v123_v26 = vpop.eup %122 }
  0x46   :  { %v56_v27 = vmul.f32 %v123_v26, %v55_v24 }
  0x48   :  { %v58_v29 = vmul.f32 %v56_v27, %v48_v16  ;;  %v63_v30 = vrot.slane %v56_v27, %v62_v25 }
  0x4a   :  { %v59_v31 = vsub.f32 %v57_v28, %v58_v29  ;;  %v64_v32 = vmul.f32 %v63_v30, %v264_v0 }
  0x4c   :  { %v69_v33 = vrot.slane %v59_v31, %v62_v25 }
  0x4e   :  { %v71_v34 = vadd.f32 %v69_v33, %v64_v32 }
  0x50   :  { %72 = vst.msk [vmem:[#allocation5] sm:$0xff] %vm32_vm0, %v71_v34 }
  0x51   :  { %201 = shalt.err (!%p198_p0)
}
  0x52   :  { %s202_s9 = scalar_lea.hbm %s320_s3, 128 }
  0x53   :  { %p203_p1 = scmp.ne.s32.totalorder %s320_s3, %s202_s9  ;;  %p206_p2 = scmp.lt.u32.totalorder %s202_s9, %s320_s3 }
  0x55   :  { %p208_p3 = pnand %p206_p2, %p203_p1 }
  0x57   :  { %211 = shalt.err (!%p208_p3)
}
  0x58   :  { %85 = dma.vmem_to_hbm [thread:$0]  %s83_s7, 128, %s320_s3, [#allocation4]  }
  0x59   :  { %214 = dma.done.wait [#allocation4], 128  }
  0x5a   :  { %215 = vsyncadd [#allocation4], 4294967168 }
  0x5b   :  { %216 = dma.done.wait [#allocation7], 32  }
  0x5c   :  { %217 = vsyncadd [#allocation7], 4294967264 }
  0x5d   :  { %115 = vsyncpa [#allocation3], 1 }
  0x5e   :  { %116 = vsyncpa [#allocation4], 1 }
  0x5f   :  { %117 = vsyncpa [#allocation7], 1 }

</bundles_post_ra>
